<compile_context>
chip_gen: v7x
topology: tpu7x:2x2x1
jax: 0.10.0
libtpu: 0.0.40
codegen_flags: <defaults>
</compile_context>

<pallas_src>
import functools

import jax
import jax.numpy as jnp
import numpy as np
from jax.experimental import pallas as pl
from jax.experimental.pallas import tpu as pltpu


def _round_up(x, m):
    return (x + m - 1) // m * m


def _cdiv(a, b):
    return (a + b - 1) // b


def _vmem_capacity_bytes():
    """Physical VMEM of the local TPU, with a v7x-safe fallback."""
    try:
        cap = getattr(pltpu.get_tpu_info(), "vmem_capacity_bytes", None)
        if cap:
            return int(cap)
    except Exception:
        pass
    return 64 * 1024 * 1024  # conservative: v7x per-TensorCore VMEM


def _masked_sq_sum_kernel(x_ref, y_ref, out_ref, acc_ref, *, tl, nl_p, lk):
    """Accumulate per-channel sums of (x - y)^2 for one (batch, L-partition)."""
    p = pl.program_id(1)
    l = pl.program_id(2)

    @pl.when(l == 0)
    def _():
        acc_ref[...] = jnp.zeros_like(acc_ref)

    x = x_ref[0].astype(jnp.float32)          # (Cp, tl), upcast in-register
    y = y_ref[0].astype(jnp.float32)
    d = x - y
    d2 = d * d

    start = (p * nl_p + l) * tl               # first L index covered by this tile

    @pl.when(start + tl <= lk)                # full tile: pure VPU accumulate
    def _():
        acc_ref[...] += d2

    @pl.when(start + tl > lk)                 # ragged / phantom tile: mask OOB lanes
    def _():
        col = jax.lax.broadcasted_iota(jnp.int32, d2.shape, 1)
        acc_ref[...] += jnp.where(start + col < lk, d2, jnp.float32(0.0))

    @pl.when(l == nl_p - 1)                   # finalize: one cross-lane reduce
    def _():
        out_ref[...] = jnp.sum(acc_ref[...], axis=1,
                               keepdims=True).reshape(out_ref.shape)


def masked_mse_loss(pred_h, gt_h, mask, *, max_tile_l=None):
    """Pallas implementation of MaskedMSELoss.forward."""
    B, C = pred_h.shape[0], pred_h.shape[1]
    L = int(np.prod(pred_h.shape[2:])) if pred_h.ndim > 2 else 1

    x = pred_h.reshape(B, C, L)               # native dtype, no f32 copies in HBM
    y = gt_h.reshape(B, C, L)
    itemsize = max(jnp.dtype(x.dtype).itemsize, jnp.dtype(y.dtype).itemsize)

    # --- small-C sublane packing: (B, C, L) -> (B, C*k, L/k), a free view ----
    sublane_target = {1: 32, 2: 16, 4: 8}.get(itemsize, 8)
    k = 1
    if C < sublane_target:
        for cand in range(max(1, sublane_target // max(C, 1)), 1, -1):
            if L % cand == 0 and (L // cand) >= 128:
                k = cand
                break
    cp = C * k
    lk = L // k
    if k > 1:
        x = x.reshape(B, cp, lk)
        y = y.reshape(B, cp, lk)

    # --- generation-/dtype-aware tile sizing ---------------------------------
    vmem_cap = _vmem_capacity_bytes()
    budget = max(4 << 20, vmem_cap // 6)       # streamed inputs + scratch + temps
    sub = _round_up(cp, 8)
    bytes_per_lane = (2 * 2 * sub * itemsize   # x, y double-buffered, native dtype
                      + sub * 4                # f32 accumulator scratch
                      + 4 * sub * 4)           # headroom for in-kernel f32 temps
    tl_cap = max(128, (budget // bytes_per_lane) // 128 * 128)
    if max_tile_l is not None:
        tl_cap = min(tl_cap, max(128, _round_up(max_tile_l, 128)))

    if lk <= tl_cap:
        tl, nl_total = lk, 1                   # one tile == full minor dim (always legal)
    else:                                      # balanced, 128-aligned tiles, no padding
        nl_needed = _cdiv(lk, tl_cap)
        tl = _round_up(_cdiv(lk, nl_needed), 128)
        nl_total = _cdiv(lk, tl)

    # Split the reduction axis across P "parallel" partitions so a v7x chip
    # (2 TensorCores) has work even when B is small / odd.  Harmless elsewhere.
    P = 2 if nl_total >= 2 else 1
    nl_p = _cdiv(nl_total, P)

    def in_map(b, p, l):
        # Clamp phantom tiles (when P * nl_p > nl_total); kernel masks them out.
        return (b, 0, jnp.minimum(p * nl_p + l, nl_total - 1))

    kernel = functools.partial(_masked_sq_sum_kernel, tl=tl, nl_p=nl_p, lk=lk)

    raw = pl.pallas_call(
        kernel,
        out_shape=jax.ShapeDtypeStruct((B, P, cp, 1), jnp.float32),
        grid_spec=pltpu.PrefetchScalarGridSpec(
            num_scalar_prefetch=0,
            grid=(B, P, nl_p),
            in_specs=[
                pl.BlockSpec((1, cp, tl), in_map),
                pl.BlockSpec((1, cp, tl), in_map),
            ],
            out_specs=pl.BlockSpec((1, 1, cp, 1), lambda b, p, l: (b, p, 0, 0)),
            scratch_shapes=[pltpu.VMEM((cp, tl), jnp.float32)],
        ),
        compiler_params=pltpu.CompilerParams(
            dimension_semantics=("parallel", "parallel", "arbitrary"),
            vmem_limit_bytes=int(min(vmem_cap // 2, budget * 2 + (16 << 20))),
        ),
    )(x, y)

    # Tiny epilogue in plain JAX (keeps all grid axes but the last "parallel"):
    # mask weighting, /(L * cnt), NaN->0 fixup, mean over batch.
    per_bc = raw.reshape(B, P, C, k).sum(axis=(1, 3))             # (B, C) Σ_L d²
    m2 = jnp.reshape(mask, (B, C)).astype(jnp.float32)
    cnt = jnp.sum(m2 != 0.0, axis=1).astype(jnp.float32)          # (B,)
    per_b = jnp.sum(per_bc * m2, axis=1) / (jnp.float32(L) * cnt)
    per_b = jnp.where(jnp.isnan(per_b), jnp.float32(0.0), per_b)  # torch: diff2[diff2!=diff2]=0
    return jnp.mean(per_b)


def _ref_masked_mse_loss(pred_h, gt_h, mask):
    """Pure-JAX reference mirroring the PyTorch semantics."""
    B, C = pred_h.shape[0], pred_h.shape[1]
    x = pred_h.reshape(B, C, -1).astype(jnp.float32)
    y = gt_h.reshape(B, C, -1).astype(jnp.float32)
    m = mask.reshape(B, C, 1).astype(jnp.float32)
    d2 = ((x - y) ** 2) * m
    d2 = d2.mean(axis=2)                                   # (B, C)
    per_b = d2.sum(axis=1) / jnp.sum(m != 0, axis=(1, 2))  # (B,)
    per_b = jnp.where(jnp.isnan(per_b), 0.0, per_b)
    return per_b.mean()


if __name__ == "__main__":
    key = jax.random.PRNGKey(0)
    k1, k2, k3 = jax.random.split(key, 3)

    B, C, H, W = 2, 4, 16, 16
    pred_h = jax.random.normal(k1, (B, C, H, W), dtype=jnp.float32)
    gt_h = jax.random.normal(k2, (B, C, H, W), dtype=jnp.float32)
    # Per-(batch, channel) mask; batch 1 fully masked out exercises the
    # 0/0 -> NaN -> 0 path of the original module.
    mask = jax.random.bernoulli(k3, p=0.7, shape=(B, C)).astype(jnp.float32)
    mask = mask.at[1].set(0.0)

    # 1) f32 base case (single tile, sublane-packed C=4 -> 8).
    out = jax.block_until_ready(masked_mse_loss(pred_h, gt_h, mask))
    ref = _ref_masked_mse_loss(pred_h, gt_h, mask)
    np.testing.assert_allclose(np.asarray(out), np.asarray(ref),
                               rtol=1e-5, atol=1e-6)

    # 2) bf16 native-dtype passthrough (upcast happens inside the kernel).
    out_bf = jax.block_until_ready(
        masked_mse_loss(pred_h.astype(jnp.bfloat16), gt_h.astype(jnp.bfloat16), mask))
    ref_bf = _ref_masked_mse_loss(pred_h.astype(jnp.bfloat16),
                                  gt_h.astype(jnp.bfloat16), mask)
    np.testing.assert_allclose(np.asarray(out_bf), np.asarray(ref_bf),
                               rtol=1e-4, atol=1e-5)

    # 3) Non-multiple-of-128 spatial size (15x15 = 225) with forced small tiles:
    #    exercises the in-kernel ragged lane mask, the 2-way core split of the
    #    L axis and the clamped phantom-tile path — all without jnp.pad.
    pred2 = jax.random.normal(k1, (B, C, 15, 15), dtype=jnp.float32)
    gt2 = jax.random.normal(k2, (B, C, 15, 15), dtype=jnp.float32)
    out2 = jax.block_until_ready(masked_mse_loss(pred2, gt2, mask, max_tile_l=128))
    ref2 = _ref_masked_mse_loss(pred2, gt2, mask)
    np.testing.assert_allclose(np.asarray(out2), np.asarray(ref2),
                               rtol=1e-5, atol=1e-6)

    # 4) Multi-step reduction per partition (nl_p >= 2) with the core split.
    pred3 = jax.random.normal(k1, (B, C, 32, 32), dtype=jnp.float32)
    gt3 = jax.random.normal(k2, (B, C, 32, 32), dtype=jnp.float32)
    out3 = jax.block_until_ready(masked_mse_loss(pred3, gt3, mask, max_tile_l=128))
    ref3 = _ref_masked_mse_loss(pred3, gt3, mask)
    np.testing.assert_allclose(np.asarray(out3), np.asarray(ref3),
                               rtol=1e-5, atol=1e-6)

    print("KERNEL_OK")
</pallas_src>

<mosaic_0001>
module attributes {stable_mosaic.version = 11 : i64} {
  func.func @_masked_sq_sum_kernel(%arg0: i32, %arg1: i32, %arg2: i32, %arg3: memref<1x8x128xf32, #tpu.memory_space<vmem>>, %arg4: memref<1x8x128xf32, #tpu.memory_space<vmem>>, %arg5: memref<1x1x8x1xf32, #tpu.memory_space<vmem>>, %arg6: memref<8x128xf32, #tpu.memory_space<vmem>>) attributes {dimension_semantics = [#tpu.dimension_semantics<parallel>, #tpu.dimension_semantics<parallel>, #tpu.dimension_semantics<arbitrary>], iteration_bounds = array<i64: 2, 1, 1>, scalar_prefetch = 0 : i64, scratch_operands = 1 : i64, tpu.core_type = #tpu.core_type<tc>, window_params = [{transform_indices = @transform_0, window_bounds = array<i64: 1, 8, 128>}, {transform_indices = @transform_1, window_bounds = array<i64: 1, 8, 128>}, {transform_indices = @transform_2, window_bounds = array<i64: 1, 1, 8, 1>}]} {
    %c0_i32 = arith.constant 0 : i32
    %0 = arith.cmpi eq, %arg2, %c0_i32 : i32
    %1 = arith.extui %0 : i1 to i32
    %c0_i32_0 = arith.constant 0 : i32
    %2 = arith.cmpi ne, %1, %c0_i32_0 : i32
    scf.if %2 {
      %cst = arith.constant 0.000000e+00 : f32
      %23 = vector.broadcast %cst : f32 to vector<8x128xf32>
      %c0_14 = arith.constant 0 : index
      %c0_15 = arith.constant 0 : index
      %24 = vector.load %arg6[%c0_14, %c0_15] : memref<8x128xf32, #tpu.memory_space<vmem>>, vector<8x128xf32>
      tpu.vector_store %arg6[%c0_14, %c0_15], %23 {strides = array<i32>} : memref<8x128xf32, #tpu.memory_space<vmem>>, vector<8x128xf32>,
    } else {
    }
    %c0 = arith.constant 0 : index
    %c0_1 = arith.constant 0 : index
    %c0_2 = arith.constant 0 : index
    %3 = vector.load %arg3[%c0, %c0_1, %c0_2] : memref<1x8x128xf32, #tpu.memory_space<vmem>>, vector<1x8x128xf32>
    %4 = vector.shape_cast %3 : vector<1x8x128xf32> to vector<8x128xf32>
    %c0_3 = arith.constant 0 : index
    %c0_4 = arith.constant 0 : index
    %c0_5 = arith.constant 0 : index
    %5 = vector.load %arg4[%c0_3, %c0_4, %c0_5] : memref<1x8x128xf32, #tpu.memory_space<vmem>>, vector<1x8x128xf32>
    %6 = vector.shape_cast %5 : vector<1x8x128xf32> to vector<8x128xf32>
    %7 = arith.subf %4, %6 : vector<8x128xf32>
    %8 = arith.mulf %7, %7 : vector<8x128xf32>
    %c1_i32 = arith.constant 1 : i32
    %9 = arith.muli %arg1, %c1_i32 : i32
    %10 = arith.addi %9, %arg2 : i32
    %c128_i32 = arith.constant 128 : i32
    %11 = arith.muli %10, %c128_i32 : i32
    %c128_i32_6 = arith.constant 128 : i32
    %12 = arith.addi %11, %c128_i32_6 : i32
    %c128_i32_7 = arith.constant 128 : i32
    %13 = arith.cmpi sle, %12, %c128_i32_7 : i32
    %14 = arith.extui %13 : i1 to i32
    %c0_i32_8 = arith.constant 0 : i32
    %15 = arith.cmpi ne, %14, %c0_i32_8 : i32
    scf.if %15 {
      %c0_14 = arith.constant 0 : index
      %c0_15 = arith.constant 0 : index
      %23 = vector.load %arg6[%c0_14, %c0_15] : memref<8x128xf32, #tpu.memory_space<vmem>>, vector<8x128xf32>
      %24 = arith.addf %23, %8 : vector<8x128xf32>
      %c0_16 = arith.constant 0 : index
      %c0_17 = arith.constant 0 : index
      %25 = vector.load %arg6[%c0_16, %c0_17] : memref<8x128xf32, #tpu.memory_space<vmem>>, vector<8x128xf32>
      tpu.vector_store %arg6[%c0_16, %c0_17], %24 {strides = array<i32>} : memref<8x128xf32, #tpu.memory_space<vmem>>, vector<8x128xf32>,
    } else {
    }
    %c128_i32_9 = arith.constant 128 : i32
    %16 = arith.addi %11, %c128_i32_9 : i32
    %c128_i32_10 = arith.constant 128 : i32
    %17 = arith.cmpi sgt, %16, %c128_i32_10 : i32
    %18 = arith.extui %17 : i1 to i32
    %c0_i32_11 = arith.constant 0 : i32
    %19 = arith.cmpi ne, %18, %c0_i32_11 : i32
    scf.if %19 {
      %23 = tpu.iota {dimensions = array<i32: 1>} : vector<8x128xi32>
      %c0_14 = arith.constant 0 : index
      %c0_15 = arith.constant 0 : index
      %24 = vector.load %arg6[%c0_14, %c0_15] : memref<8x128xf32, #tpu.memory_space<vmem>>, vector<8x128xf32>
      %25 = vector.broadcast %11 : i32 to vector<8x128xi32>
      %26 = arith.addi %25, %23 : vector<8x128xi32>
      %c128_i32_16 = arith.constant 128 : i32
      %27 = vector.broadcast %c128_i32_16 : i32 to vector<8x128xi32>
      %28 = arith.cmpi slt, %26, %27 : vector<8x128xi32>
      %cst = arith.constant 0.000000e+00 : f32
      %29 = vector.broadcast %cst : f32 to vector<8x128xf32>
      %30 = arith.select %28, %8, %29 : vector<8x128xi1>, vector<8x128xf32>
      %31 = arith.addf %24, %30 : vector<8x128xf32>
      %c0_17 = arith.constant 0 : index
      %c0_18 = arith.constant 0 : index
      %32 = vector.load %arg6[%c0_17, %c0_18] : memref<8x128xf32, #tpu.memory_space<vmem>>, vector<8x128xf32>
      tpu.vector_store %arg6[%c0_17, %c0_18], %31 {strides = array<i32>} : memref<8x128xf32, #tpu.memory_space<vmem>>, vector<8x128xf32>,
    } else {
    }
    %c0_i32_12 = arith.constant 0 : i32
    %20 = arith.cmpi eq, %arg2, %c0_i32_12 : i32
    %21 = arith.extui %20 : i1 to i32
    %c0_i32_13 = arith.constant 0 : i32
    %22 = arith.cmpi ne, %21, %c0_i32_13 : i32
    scf.if %22 {
      %c0_14 = arith.constant 0 : index
      %c0_15 = arith.constant 0 : index
      %23 = vector.load %arg6[%c0_14, %c0_15] : memref<8x128xf32, #tpu.memory_space<vmem>>, vector<8x128xf32>
      %cst = arith.constant dense<0.000000e+00> : vector<8xf32>
      %24 = vector.multi_reduction <add>, %23, %cst [1] : vector<8x128xf32> to vector<8xf32>
      %25 = vector.shape_cast %24 : vector<8xf32> to vector<8x1xf32>
      %26 = vector.shape_cast %25 : vector<8x1xf32> to vector<1x1x8x1xf32>
      %c0_16 = arith.constant 0 : index
      %c0_17 = arith.constant 0 : index
      %c0_18 = arith.constant 0 : index
      %c0_19 = arith.constant 0 : index
      %27 = vector.load %arg5[%c0_16, %c0_17, %c0_18, %c0_19] : memref<1x1x8x1xf32, #tpu.memory_space<vmem>>, vector<1x1x8x1xf32>
      tpu.vector_store %arg5[%c0_16, %c0_17, %c0_18, %c0_19], %26 {strides = array<i32>} : memref<1x1x8x1xf32, #tpu.memory_space<vmem>>, vector<1x1x8x1xf32>,
    } else {
    }
    return
  }
  func.func @transform_0(%arg0: i32, %arg1: i32, %arg2: i32) -> (i32, i32, i32) {
    %c1_i32 = arith.constant 1 : i32
    %0 = arith.muli %arg1, %c1_i32 : i32
    %1 = arith.addi %0, %arg2 : i32
    %c0_i32 = arith.constant 0 : i32
    %2 = arith.minsi %1, %c0_i32 : i32
    %c0_i32_0 = arith.constant 0 : i32
    %c0_i32_1 = arith.constant 0 : i32
    return %arg0, %c0_i32_0, %2 : i32, i32, i32
  }
  func.func @transform_1(%arg0: i32, %arg1: i32, %arg2: i32) -> (i32, i32, i32) {
    %c1_i32 = arith.constant 1 : i32
    %0 = arith.muli %arg1, %c1_i32 : i32
    %1 = arith.addi %0, %arg2 : i32
    %c0_i32 = arith.constant 0 : i32
    %2 = arith.minsi %1, %c0_i32 : i32
    %c0_i32_0 = arith.constant 0 : i32
    %c0_i32_1 = arith.constant 0 : i32
    return %arg0, %c0_i32_0, %2 : i32, i32, i32
  }
  func.func @transform_2(%arg0: i32, %arg1: i32, %arg2: i32) -> (i32, i32, i32, i32) {
    %c0_i32 = arith.constant 0 : i32
    %c0_i32_0 = arith.constant 0 : i32
    %c0_i32_1 = arith.constant 0 : i32
    return %arg0, %arg1, %c0_i32, %c0_i32_0 : i32, i32, i32, i32
  }
}

</mosaic_0001>

<bundles_post_ra>
// kernel: tpu_custom_call.1
= control target key start
LH: loop header
LB: loop body
LE: loop exit
PB: predicated region body
PF: predicated region fallthrough
CT: control target
= control target key end

     0   :  { %7 = vsyncpa [#allocation4], 0  ;;  %s783_s0 = inlined_call_operand.hbm [shape: f32[2,8,128], index: 0, kind: input, shape index: {}]   ;;  %s784_s1 = inlined_call_operand.hbm [shape: f32[2,8,128], index: 1, kind: input, shape index: {}]   ;;  %s785_s2 = inlined_call_operand.vmem [shape: f32[2,1,8,1], index: 2, kind: output, shape index: {}]  }
   0x1   :  { %9 = vsyncpa [#allocation4 + $0x1], 0 }
   0x2   :  { %10 = vsyncpa [#allocation6], 0 }
   0x3   :  { %12 = vsyncpa [#allocation6 + $0x1], 0  ;;  %s611_s9 = smov 0   ;;  %s613_s10 = smov 0  }
   0x4   :  { %s615_s11 = smov 0   ;;  %s617_s12 = smov 0  }
   0x5   :  { %s619_s13 = smov 0   ;;  %s621_s14 = smov 0  }
   0x6 LB: > { %s404_s15 = sadd.s32 4294967295, %s592_s14   ;;  %s37_s16 = sadd.s32 1, %s588_s13  ;;  %s592_s14 = sphi %s621_s14, %s18_s14   ;;  %s588_s13 = sphi %s619_s13, %s799_s13   ;;  %s584_s12 = sphi %s617_s12, %s798_s12   ;;  %s580_s11 = sphi %s615_s11, %s797_s11   ;;  %s576_s10 = sphi %s613_s10, %s796_s10   ;;  %s572_s9 = sphi %s611_s9, %s795_s9  }
   0x7   : > { %p39_p0 = scmp.ge.s32.totalorder %s37_s16, 2  ;;  %s52_s17 = sadd.s32 1, %s580_s11 }
   0x8   : > { %p59_p1 = scmp.ne.s32.totalorder %s580_s11, %s576_s10  ;;  %p60_p2 = scmp.eq.s32.totalorder %s592_s14, 0 }
   0x9   : > { %s801_s16 = smov (%p39_p0, %s37_s16), 0  ;;  %p65_p4 = scmp.ne.s32.totalorder %s576_s10, %s572_s9 }
   0xa   : > { %p647_p3 = por %p60_p2, %p59_p1  ;;  %s47_s19 = ssub.s32 %s588_s13, %s801_s16 }
   0xb   : > { %p66_p5 = scmp.eq.s32.totalorder %s404_s15, 0  ;;  %p50_p6 = scmp.eq.s32.totalorder %s47_s19, 0 }
   0xc   : > { %p429_p8 = scmp.lt.s32.totalorder %s592_s14, 2  ;;  %s663_s22 = sand.u32 1, %s580_s11  }
   0xd   : > { %p654_p7 = por %p66_p5, %p65_p4  ;;  %s409_s23 = sshll.u32 %s588_s13, 7 }
   0xe   : > { %s660_s21 = scalar_select %p50_p6, %s580_s11, %s52_s17  }
   0xf   : > { %s788_s20 = scalar_select %p654_p7, 1, 0 }
  0x10   : > { %s408_s24 = sshll.u32 %s663_s22, 3  ;;  %s672_s27 = scalar_lea.hbm %s783_s0, %s409_s23 }
  0x11   : > { %s155_s28 = scalar_lea.vmem [#allocation3], %s408_s24  ;;  %p678_p9 = pnand %p429_p8, %p647_p3 }
  0x12   : > { %s166_s29 = sshll.u32 %s155_s28, 4  ;;  %s152_s3 = scalar_lea.sflag [#allocation4], %s663_s22  ;;  %s682_s29 = int_to_ptr.vmem [resolvable:$true] %s166_s29 }
  0x13   : > { %s478_s4 = scalar_lea.hbm %s672_s27, 128  ;;  %p480_p13 = pneg %p678_p9 }
  0x14   : > { %p479_p12 = scmp.ne.s32.totalorder %s672_s27, %s478_s4  ;;  %s483_s7 = scalar_lea.hbm %s783_s0, 256 }
  0x15   : > { %p484_p2 = scmp.lt.u32.totalorder %s672_s27, %s783_s0  ;;  %p485_p3 = scmp.lt.u32.totalorder %s483_s7, %s478_s4 }
  0x16   : > { %p481_p0 = pnand %p480_p13, %p479_p12  ;;  %p487_p5 = scmp.lt.u32.totalorder %s478_s4, %s672_s27 }
  0x17   : > { %p486_p4 = por %p485_p3, %p484_p2 }
  0x18   : > { %p482_p1 = pneg %p481_p0 }
  0x19   : > { %p488_p6 = por %p487_p5, %p486_p4 }
  0x1b   : > { %p489_p8 = pnand %p488_p6, %p482_p1 }
  0x1d   : > { %492 = shalt.err (!%p489_p8)
}
  0x1e   : > { %s493_s15 = scalar_lea.vmem %s682_s29, 128  ;;  %s594_s17 = smov [#allocation3]  }
  0x1f   : > { %p494_p12 = scmp.ne.s32.totalorder %s682_s29, %s493_s15  ;;  %s498_s18 = sshll.u32 %s594_s17, 4  ;;  %s499_s18 = int_to_ptr.vmem [resolvable:$false] %s498_s18 }
  0x20   : > { %s500_s19 = scalar_lea.vmem %s499_s18, 256  ;;  %p501_p11 = scmp.lt.s32.totalorder %s682_s29, %s499_s18 }
  0x21   : > { %p496_p0 = pnand %p494_p12, %p480_p13  ;;  %p502_p2 = scmp.lt.s32.totalorder %s500_s19, %s493_s15 }
  0x23   : > { %p497_p10 = pneg %p496_p0  ;;  %p503_p3 = por %p502_p2, %p501_p11 }
  0x25   : > { %p504_p4 = pnand %p503_p3, %p497_p10 }
  0x27   : > { %507 = shalt.err (!%p504_p4)
}
  0x28   : > { %425 = dma.hbm_to_vmem [thread:$0]  (!%p678_p9), %s672_s27, 128, %s682_s29, %s152_s3  }
  0x29   : > { %p790_p1 = scmp.lt.s32.totalorder %s592_s14, 3  ;;  %p791_p5 = scmp.ge.s32.totalorder %s592_s14, 1 }
  0x2a   : > { %s725_s4 = scalar_lea.hbm %s784_s1, %s409_s23  ;;  %s177_s5 = scalar_lea.vmem [#allocation5], %s408_s24 }
  0x2b   : > { %p716_p6 = pnand %p791_p5, %p790_p1  ;;  %s188_s6 = sshll.u32 %s177_s5, 4  ;;  %s189_s6 = int_to_ptr.vmem [resolvable:$true] %s188_s6 }
  0x2c   : > { %s174_s27 = scalar_lea.sflag [#allocation6], %s663_s22  ;;  %s508_s29 = scalar_lea.hbm %s725_s4, 128 }
  0x2d   : > { %s792_s25 = scalar_select %p716_p6, 1, 0 }
  0x2e   : > { %p509_p10 = scmp.ne.s32.totalorder %s725_s4, %s508_s29  ;;  %s513_s23 = scalar_lea.hbm %s784_s1, 256 }
  0x2f   : > { %p514_p12 = scmp.lt.u32.totalorder %s725_s4, %s784_s1  ;;  %p515_p0 = scmp.lt.u32.totalorder %s513_s23, %s508_s29 }
  0x30   : > { %p511_p11 = pnand %p509_p10, %p480_p13  ;;  %p517_p3 = scmp.lt.u32.totalorder %s508_s29, %s725_s4 }
  0x31   : > { %p516_p2 = por %p515_p0, %p514_p12 }
  0x32   : > { %p512_p8 = pneg %p511_p11 }
  0x33   : > { %p518_p4 = por %p517_p3, %p516_p2 }
  0x35   : > { %p519_p1 = pnand %p518_p4, %p512_p8 }
  0x37   : > { %522 = shalt.err (!%p519_p1)
}
  0x38   : > { %s523_s22 = scalar_lea.vmem %s189_s6, 128  ;;  %s595_s24 = smov [#allocation5]  }
  0x39   : > { %p524_p5 = scmp.ne.s32.totalorder %s189_s6, %s523_s22  ;;  %s528_s15 = sshll.u32 %s595_s24, 4  ;;  %s529_s15 = int_to_ptr.vmem [resolvable:$false] %s528_s15 }
  0x3a   : > { %s530_s17 = scalar_lea.vmem %s529_s15, 256  ;;  %p531_p7 = scmp.lt.s32.totalorder %s189_s6, %s529_s15 }
  0x3b   : > { %p526_p10 = pnand %p524_p5, %p480_p13  ;;  %p532_p6 = scmp.lt.s32.totalorder %s530_s17, %s523_s22 }
  0x3d   : > { %p527_p11 = pneg %p526_p10  ;;  %p533_p0 = por %p532_p6, %p531_p7 }
  0x3f   : > { %p534_p12 = pnand %p533_p0, %p527_p11 }
  0x41   : > { %537 = shalt.err (!%p534_p12)
}
  0x42   : > { %428 = dma.hbm_to_vmem [thread:$0]  (!%p678_p9), %s725_s4, 128, %s189_s6, %s174_s27  }
  0x43   : > { %p793_p8 = scmp.ne.s32.totalorder %s792_s25, 0 }
  0x44   : > { %s199_s18 = sand.u32 (!%p793_p8), 1, %s576_s10   ;;  %p794_p13 = scmp.ne.s32.totalorder (!%p793_p8), %s788_s20, 0 }
  0x45   : > { %197 = sbr.rel (%p793_p8) target bundleno = 227 (0xe3), region = 28  ;;  %s413_s19 = sshll.u32 (!%p793_p8), %s199_s18, 3 }
  0x46   : > { %s200_s26 = scalar_lea.sflag (!%p793_p8), [#allocation4], %s199_s18  ;;  %s203_s28 = scalar_lea.vmem (!%p793_p8), [#allocation3], %s413_s19 }
  0x4c   : > { %563 = dma.done.wait (%p794_p13), %s200_s26, 128  }
  0x4d   : > { %565 = vsyncadd (%p794_p13), %s200_s26, 4294967168  ;;  %s209_s5 = scalar_lea.sflag [#allocation6], %s199_s18  ;;  %s212_s29 = scalar_lea.vmem [#allocation5], %s413_s19 }
  0x4e   : > { %567 = dma.done.wait (%p794_p13), %s209_s5, 128  }
  0x4f   : > { %569 = vsyncadd (%p794_p13), %s209_s5, 4294967168  ;;  %v258_v0 = vld [vmem:[%s203_s28] sm:$0xff]  ;;  %v259_v1 = vld [vmem:[%s212_s29] sm:$0xff]  ;;  %p246_p7 = scmp.lt.s32.totalorder %s584_s12, 1  ;;  %vm291_vm0 = vcmask 7168  }
  0x50   : > { %v260_v2 = vsub.f32 %v258_v0, %v259_v1 }
  0x51   : > { %s803_s12 = smov (!%p246_p7, %s584_s12), 1 }
  0x52   : > { %v261_v3 = vmul.f32 %v260_v2, %v260_v2  ;;  %s415_s30 = sshll.u32 %s803_s12, 3 }
  0x53   : > { %s252_s6 = scalar_lea.vmem %s785_s2, %s415_s30 }
  0x54   : > { %289 = vadd.xlane.f32.xlu0 %v261_v3 }
  0xe1   : > { %v290_v4 = vpop.xlane.xlu0 %289 }
  0xe2   : > { %292 = vst.msk [vmem:[%s252_s6] sm:$0xff] %vm291_vm0, %v290_v4 }
  0xe3 PF: > { %s18_s14 = sadd.s32 1, %s592_s14   ;;  %s795_s9 = smov %s576_s10 }
  0xe4   : > { %p15_p9 = scmp.ge.s32.totalorder %s18_s14, 4   ;;  %s796_s10 = smov %s580_s11 }
  0xe5   : > { %s797_s11 = smov %s660_s21  ;;  %s798_s12 = smov %s588_s13 }
  0xe6   : > { %s799_s13 = smov %s801_s16  ;;  %17 = sbr.rel (!%p15_p9) target bundleno = 6 (0x6), region = 97 }
  0xed   :  { %318 = vsyncpa [#allocation4], 1 }
  0xee   :  { %320 = vsyncpa [#allocation4 + $0x1], 1 }
  0xef   :  { %321 = vsyncpa [#allocation6], 1 }
  0xf0   :  { %323 = vsyncpa [#allocation6 + $0x1], 1 }

</bundles_post_ra>
